<compile_context>
chip_gen: v7x
topology: tpu7x:2x2x1
jax: 0.10.0
libtpu: 0.0.40
codegen_flags: <defaults>
</compile_context>

<pallas_src>
import functools

import jax
import jax.numpy as jnp
from jax.experimental import pallas as pl
from jax.experimental.pallas import tpu as pltpu


def _cdiv(a, b):
    return -(-a // b)


def _shuffle_kernel(x_ref, o_ref, t_ref, ot_ref, *, s, cc, hin, win, group, cgroup):
    """One block of `group` fused (b, cout) slabs.

    x_ref : (group, s*s, Hin, Win*cc)         input channels of the block
    o_ref : (group, Hin, s*s*Win*cc)          output rows, (Hin, sb, Win, sa, cc) fused
    t_ref : (Win*cc, group*Hin)     VMEM      one channel, transposed (lanes = group*Hin)
    ot_ref: (s*s*Win*cc, group*Hin) VMEM      transposed output slab of the block
    """
    wc = win * cc          # lane width of one input channel row
    woc = s * wc           # Wout*cc: lane width of one output row phase sb
    s2 = s * s

    for sa in range(s):
        for sb in range(s):
            k = sa * s + sb
            # 1) Stage channel k of the whole block in transposed form so the (w, c)
            #    structure sits on sublanes and the big group*Hin axis on lanes.
            #    Chunked over `group` to bound live vector values (vreg pressure).
            for j in range(0, group, cgroup):
                e = min(j + cgroup, group)
                slab = x_ref[j:e, k, :, :].reshape((e - j) * hin, wc)
                t_ref[:, j * hin:e * hin] = jnp.transpose(slab)

            # 2) W-interleave with sublane-strided copies only (lanes stay dense):
            #      ot[sb*woc + w*s*cc + sa*cc + c, :] = t[w*cc + c, :]
            for c in range(cc):
                src = (t_ref[pl.ds(c, win, stride=cc), :] if cc > 1
                       else t_ref[...])
                ot_ref[pl.ds(sb * woc + sa * cc + c, win, stride=s * cc), :] = src

    # 3) Transpose the assembled slab back and store it lane-dense
    #    (o_ref last dim = s*s*Win*cc; a multiple of 128 at realistic widths).
    for j in range(0, group, cgroup):
        e = min(j + cgroup, group)
        o_ref[j:e, :, :] = jnp.transpose(
            ot_ref[:, j * hin:e * hin]).reshape(e - j, hin, s2 * wc)


def _shuffle_core(x4, *, s, hin, win, cc, in_budget=4 * 1024 * 1024):
    """x4: (N, s*s, Hin, Win*cc) -> (N, Hin, s*s*Win*cc), N = B*Cout."""
    n, s2, hin_, wc = x4.shape
    assert s2 == s * s and hin_ == hin and wc == win * cc
    itemsize = x4.dtype.itemsize
    # Native sublane tile: 8 rows for 32-bit, 16 for 16-bit, 32 for 8-bit dtypes.
    subl = max(8, 32 // itemsize)

    # ---- block sizing: largest group under the byte budget, >=2 grid steps ----
    per_item = s2 * hin * wc * itemsize            # one (b, cout) slab
    group = max(1, min(n, in_budget // max(per_item, 1)))
    if n >= 2:
        group = min(group, _cdiv(n, 2))            # keep >=2 parallel steps (megacore)
    if hin % subl != 0:
        group = min(group, 8)                      # compat: per-channel transposes only
    nblocks = _cdiv(n, group)

    # ---- transpose chunking: ~128 KiB live value per transpose, <= 8 chunks ----
    if hin % subl == 0:
        cgroup = max(1, (128 * 1024) // max(hin * wc * itemsize, 1))
    else:
        cgroup = 1                                 # merging (g, Hin) rows needs Hin % subl == 0
    cgroup = min(max(cgroup, _cdiv(group, 8)), group)

    block_bytes = group * per_item
    # in + out double buffers (4x block) + scratch (~1.25x block) -> keep headroom.
    vmem_limit = min(max(32 * 1024 * 1024, 6 * block_bytes), 96 * 1024 * 1024)

    kernel = functools.partial(_shuffle_kernel, s=s, cc=cc, hin=hin, win=win,
                               group=group, cgroup=cgroup)
    nbytes = x4.size * itemsize
    return pl.pallas_call(
        kernel,
        out_shape=jax.ShapeDtypeStruct((n, hin, s2 * wc), x4.dtype),
        grid=(nblocks,),
        in_specs=[pl.BlockSpec((group, s2, hin, wc), lambda i: (i, 0, 0, 0))],
        out_specs=pl.BlockSpec((group, hin, s2 * wc), lambda i: (i, 0, 0)),
        scratch_shapes=[pltpu.VMEM((wc, group * hin), x4.dtype),
                        pltpu.VMEM((s2 * wc, group * hin), x4.dtype)],
        compiler_params=pltpu.CompilerParams(
            dimension_semantics=("parallel",),
            vmem_limit_bytes=vmem_limit),
        cost_estimate=pl.CostEstimate(flops=0, transcendentals=0,
                                      bytes_accessed=2 * nbytes),
    )(x4)


def complex_shuffle_up(x, scale):
    """x: (B, Cin, Hin, Win, CC) -> (B, Cin//scale^2, Hin*scale, Win*scale, CC)."""
    b, cin, hin, win, cc = x.shape
    s = int(scale)
    assert cin % (s * s) == 0, "cin must be divisible by scale**2"
    cout = cin // (s * s)
    if s == 1:
        return x

    itemsize = x.dtype.itemsize
    ratio = (4 // itemsize) if itemsize < 4 else 1
    if ratio > 1 and cc % ratio == 0:
        # Pack `ratio` consecutive complex components into one 32-bit word (free,
        # host-side bitcast) so the in-kernel interleave runs on 32-bit lanes and the
        # per-component loop collapses (e.g. a bf16 complex pair -> one uint32).
        cck = cc // ratio
        xp = jax.lax.bitcast_convert_type(
            x.reshape(b * cout, s * s, hin, win * cck, ratio), jnp.uint32)
        out = _shuffle_core(xp, s=s, hin=hin, win=win, cc=cck)
        out = jax.lax.bitcast_convert_type(out, x.dtype)   # appends a trailing `ratio` dim
        return out.reshape(b, cout, hin * s, win * s, cc)

    # TODO(synk): sub-32-bit dtypes whose complex dim does not pack into 32 bits fall
    # through here; the sublane-strided copies then act directly on packed rows.
    x4 = x.reshape(b * cout, s * s, hin, win * cc)
    out = _shuffle_core(x4, s=s, hin=hin, win=win, cc=cc)
    # (N, Hin, s*Wout*CC) is a contiguous view of (B, Cout, Hout, Wout, CC).
    return out.reshape(b, cout, hin * s, win * s, cc)


def _reference(x, scale):
    """Pure-JAX transcription of the PyTorch forward (view/permute/view)."""
    b, cin, hin, win, cc = x.shape
    cout = cin // scale ** 2
    y = x.reshape(b, cout, scale, scale, hin, win, cc)
    y = jnp.transpose(y, (0, 1, 4, 3, 5, 2, 6))
    return y.reshape(b, cout, hin * scale, win * scale, cc)


if __name__ == "__main__":
    key = jax.random.PRNGKey(0)
    scale = 2
    # (batch=2, cin=8, hin=16, win=16, complex=2) -> (2, 2, 32, 32, 2)
    x = jax.random.normal(key, (2, 8, 16, 16, 2), dtype=jnp.float32)

    y = jax.block_until_ready(complex_shuffle_up(x, scale))

    y_ref = _reference(x, scale)
    assert y.shape == (2, 2, 32, 32, 2), y.shape
    assert jnp.array_equal(y, y_ref), float(jnp.max(jnp.abs(y - y_ref)))
    print("KERNEL_OK")
</pallas_src>

<mosaic_0001>
module attributes {stable_mosaic.version = 11 : i64} {
  func.func @_shuffle_kernel(%arg0: i32, %arg1: memref<2x4x16x32xf32, #tpu.memory_space<vmem>>, %arg2: memref<2x16x128xf32, #tpu.memory_space<vmem>>, %arg3: memref<32x32xf32, #tpu.memory_space<vmem>>, %arg4: memref<128x32xf32, #tpu.memory_space<vmem>>) attributes {dimension_semantics = [#tpu.dimension_semantics<parallel>], iteration_bounds = array<i64: 2>, scalar_prefetch = 0 : i64, scratch_operands = 2 : i64, tpu.core_type = #tpu.core_type<tc>, window_params = [{transform_indices = @transform_0, window_bounds = array<i64: 2, 4, 16, 32>}, {transform_indices = @transform_1, window_bounds = array<i64: 2, 16, 128>}]} {
    %c0 = arith.constant 0 : index
    %c0_0 = arith.constant 0 : index
    %c0_1 = arith.constant 0 : index
    %c0_2 = arith.constant 0 : index
    %0 = vector.load %arg1[%c0, %c0_0, %c0_1, %c0_2] : memref<2x4x16x32xf32, #tpu.memory_space<vmem>>, vector<2x1x16x32xf32>
    %1 = vector.shape_cast %0 : vector<2x1x16x32xf32> to vector<2x16x32xf32>
    %2 = vector.shape_cast %1 : vector<2x16x32xf32> to vector<32x32xf32>
    %3 = tpu.transpose %2, [1, 0] : vector<32x32xf32> -> vector<32x32xf32>
    %c0_3 = arith.constant 0 : index
    %c0_4 = arith.constant 0 : index
    %4 = vector.load %arg3[%c0_3, %c0_4] : memref<32x32xf32, #tpu.memory_space<vmem>>, vector<32x32xf32>
    tpu.vector_store %arg3[%c0_3, %c0_4], %3 {strides = array<i32>} : memref<32x32xf32, #tpu.memory_space<vmem>>, vector<32x32xf32>,
    %c0_5 = arith.constant 0 : index
    %c0_6 = arith.constant 0 : index
    %5 = tpu.strided_load %arg3[%c0_5, %c0_6] {strides = array<i32: 2, 1>} : memref<32x32xf32, #tpu.memory_space<vmem>>, vector<16x32xf32>
    %c0_7 = arith.constant 0 : index
    %c0_8 = arith.constant 0 : index
    %6 = tpu.strided_load %arg4[%c0_7, %c0_8] {strides = array<i32: 4, 1>} : memref<128x32xf32, #tpu.memory_space<vmem>>, vector<16x32xf32>
    tpu.strided_store %arg4[%c0_7, %c0_8], %5 {strides = array<i32: 4, 1>} : memref<128x32xf32, #tpu.memory_space<vmem>>, vector<16x32xf32>
    %c1 = arith.constant 1 : index
    %c0_9 = arith.constant 0 : index
    %7 = tpu.strided_load %arg3[%c1, %c0_9] {strides = array<i32: 2, 1>} : memref<32x32xf32, #tpu.memory_space<vmem>>, vector<16x32xf32>
    %c1_10 = arith.constant 1 : index
    %c0_11 = arith.constant 0 : index
    %8 = tpu.strided_load %arg4[%c1_10, %c0_11] {strides = array<i32: 4, 1>} : memref<128x32xf32, #tpu.memory_space<vmem>>, vector<16x32xf32>
    tpu.strided_store %arg4[%c1_10, %c0_11], %7 {strides = array<i32: 4, 1>} : memref<128x32xf32, #tpu.memory_space<vmem>>, vector<16x32xf32>
    %c0_12 = arith.constant 0 : index
    %c1_13 = arith.constant 1 : index
    %c0_14 = arith.constant 0 : index
    %c0_15 = arith.constant 0 : index
    %9 = vector.load %arg1[%c0_12, %c1_13, %c0_14, %c0_15] : memref<2x4x16x32xf32, #tpu.memory_space<vmem>>, vector<2x1x16x32xf32>
    %10 = vector.shape_cast %9 : vector<2x1x16x32xf32> to vector<2x16x32xf32>
    %11 = vector.shape_cast %10 : vector<2x16x32xf32> to vector<32x32xf32>
    %12 = tpu.transpose %11, [1, 0] : vector<32x32xf32> -> vector<32x32xf32>
    %c0_16 = arith.constant 0 : index
    %c0_17 = arith.constant 0 : index
    %13 = vector.load %arg3[%c0_16, %c0_17] : memref<32x32xf32, #tpu.memory_space<vmem>>, vector<32x32xf32>
    tpu.vector_store %arg3[%c0_16, %c0_17], %12 {strides = array<i32>} : memref<32x32xf32, #tpu.memory_space<vmem>>, vector<32x32xf32>,
    %c0_18 = arith.constant 0 : index
    %c0_19 = arith.constant 0 : index
    %14 = tpu.strided_load %arg3[%c0_18, %c0_19] {strides = array<i32: 2, 1>} : memref<32x32xf32, #tpu.memory_space<vmem>>, vector<16x32xf32>
    %c64 = arith.constant 64 : index
    %c0_20 = arith.constant 0 : index
    %15 = tpu.strided_load %arg4[%c64, %c0_20] {strides = array<i32: 4, 1>} : memref<128x32xf32, #tpu.memory_space<vmem>>, vector<16x32xf32>
    tpu.strided_store %arg4[%c64, %c0_20], %14 {strides = array<i32: 4, 1>} : memref<128x32xf32, #tpu.memory_space<vmem>>, vector<16x32xf32>
    %c1_21 = arith.constant 1 : index
    %c0_22 = arith.constant 0 : index
    %16 = tpu.strided_load %arg3[%c1_21, %c0_22] {strides = array<i32: 2, 1>} : memref<32x32xf32, #tpu.memory_space<vmem>>, vector<16x32xf32>
    %c65 = arith.constant 65 : index
    %c0_23 = arith.constant 0 : index
    %17 = tpu.strided_load %arg4[%c65, %c0_23] {strides = array<i32: 4, 1>} : memref<128x32xf32, #tpu.memory_space<vmem>>, vector<16x32xf32>
    tpu.strided_store %arg4[%c65, %c0_23], %16 {strides = array<i32: 4, 1>} : memref<128x32xf32, #tpu.memory_space<vmem>>, vector<16x32xf32>
    %c0_24 = arith.constant 0 : index
    %c2 = arith.constant 2 : index
    %c0_25 = arith.constant 0 : index
    %c0_26 = arith.constant 0 : index
    %18 = vector.load %arg1[%c0_24, %c2, %c0_25, %c0_26] : memref<2x4x16x32xf32, #tpu.memory_space<vmem>>, vector<2x1x16x32xf32>
    %19 = vector.shape_cast %18 : vector<2x1x16x32xf32> to vector<2x16x32xf32>
    %20 = vector.shape_cast %19 : vector<2x16x32xf32> to vector<32x32xf32>
    %21 = tpu.transpose %20, [1, 0] : vector<32x32xf32> -> vector<32x32xf32>
    %c0_27 = arith.constant 0 : index
    %c0_28 = arith.constant 0 : index
    %22 = vector.load %arg3[%c0_27, %c0_28] : memref<32x32xf32, #tpu.memory_space<vmem>>, vector<32x32xf32>
    tpu.vector_store %arg3[%c0_27, %c0_28], %21 {strides = array<i32>} : memref<32x32xf32, #tpu.memory_space<vmem>>, vector<32x32xf32>,
    %c0_29 = arith.constant 0 : index
    %c0_30 = arith.constant 0 : index
    %23 = tpu.strided_load %arg3[%c0_29, %c0_30] {strides = array<i32: 2, 1>} : memref<32x32xf32, #tpu.memory_space<vmem>>, vector<16x32xf32>
    %c2_31 = arith.constant 2 : index
    %c0_32 = arith.constant 0 : index
    %24 = tpu.strided_load %arg4[%c2_31, %c0_32] {strides = array<i32: 4, 1>} : memref<128x32xf32, #tpu.memory_space<vmem>>, vector<16x32xf32>
    tpu.strided_store %arg4[%c2_31, %c0_32], %23 {strides = array<i32: 4, 1>} : memref<128x32xf32, #tpu.memory_space<vmem>>, vector<16x32xf32>
    %c1_33 = arith.constant 1 : index
    %c0_34 = arith.constant 0 : index
    %25 = tpu.strided_load %arg3[%c1_33, %c0_34] {strides = array<i32: 2, 1>} : memref<32x32xf32, #tpu.memory_space<vmem>>, vector<16x32xf32>
    %c3 = arith.constant 3 : index
    %c0_35 = arith.constant 0 : index
    %26 = tpu.strided_load %arg4[%c3, %c0_35] {strides = array<i32: 4, 1>} : memref<128x32xf32, #tpu.memory_space<vmem>>, vector<16x32xf32>
    tpu.strided_store %arg4[%c3, %c0_35], %25 {strides = array<i32: 4, 1>} : memref<128x32xf32, #tpu.memory_space<vmem>>, vector<16x32xf32>
    %c0_36 = arith.constant 0 : index
    %c3_37 = arith.constant 3 : index
    %c0_38 = arith.constant 0 : index
    %c0_39 = arith.constant 0 : index
    %27 = vector.load %arg1[%c0_36, %c3_37, %c0_38, %c0_39] : memref<2x4x16x32xf32, #tpu.memory_space<vmem>>, vector<2x1x16x32xf32>
    %28 = vector.shape_cast %27 : vector<2x1x16x32xf32> to vector<2x16x32xf32>
    %29 = vector.shape_cast %28 : vector<2x16x32xf32> to vector<32x32xf32>
    %30 = tpu.transpose %29, [1, 0] : vector<32x32xf32> -> vector<32x32xf32>
    %c0_40 = arith.constant 0 : index
    %c0_41 = arith.constant 0 : index
    %31 = vector.load %arg3[%c0_40, %c0_41] : memref<32x32xf32, #tpu.memory_space<vmem>>, vector<32x32xf32>
    tpu.vector_store %arg3[%c0_40, %c0_41], %30 {strides = array<i32>} : memref<32x32xf32, #tpu.memory_space<vmem>>, vector<32x32xf32>,
    %c0_42 = arith.constant 0 : index
    %c0_43 = arith.constant 0 : index
    %32 = tpu.strided_load %arg3[%c0_42, %c0_43] {strides = array<i32: 2, 1>} : memref<32x32xf32, #tpu.memory_space<vmem>>, vector<16x32xf32>
    %c66 = arith.constant 66 : index
    %c0_44 = arith.constant 0 : index
    %33 = tpu.strided_load %arg4[%c66, %c0_44] {strides = array<i32: 4, 1>} : memref<128x32xf32, #tpu.memory_space<vmem>>, vector<16x32xf32>
    tpu.strided_store %arg4[%c66, %c0_44], %32 {strides = array<i32: 4, 1>} : memref<128x32xf32, #tpu.memory_space<vmem>>, vector<16x32xf32>
    %c1_45 = arith.constant 1 : index
    %c0_46 = arith.constant 0 : index
    %34 = tpu.strided_load %arg3[%c1_45, %c0_46] {strides = array<i32: 2, 1>} : memref<32x32xf32, #tpu.memory_space<vmem>>, vector<16x32xf32>
    %c67 = arith.constant 67 : index
    %c0_47 = arith.constant 0 : index
    %35 = tpu.strided_load %arg4[%c67, %c0_47] {strides = array<i32: 4, 1>} : memref<128x32xf32, #tpu.memory_space<vmem>>, vector<16x32xf32>
    tpu.strided_store %arg4[%c67, %c0_47], %34 {strides = array<i32: 4, 1>} : memref<128x32xf32, #tpu.memory_space<vmem>>, vector<16x32xf32>
    %c0_48 = arith.constant 0 : index
    %c0_49 = arith.constant 0 : index
    %36 = vector.load %arg4[%c0_48, %c0_49] : memref<128x32xf32, #tpu.memory_space<vmem>>, vector<128x32xf32>
    %37 = tpu.transpose %36, [1, 0] : vector<128x32xf32> -> vector<32x128xf32>
    %38 = vector.shape_cast %37 : vector<32x128xf32> to vector<2x16x128xf32>
    %c0_50 = arith.constant 0 : index
    %c0_51 = arith.constant 0 : index
    %c0_52 = arith.constant 0 : index
    %39 = vector.load %arg2[%c0_50, %c0_51, %c0_52] : memref<2x16x128xf32, #tpu.memory_space<vmem>>, vector<2x16x128xf32>
    tpu.vector_store %arg2[%c0_50, %c0_51, %c0_52], %38 {strides = array<i32>} : memref<2x16x128xf32, #tpu.memory_space<vmem>>, vector<2x16x128xf32>,
    return
  }
  func.func @transform_0(%arg0: i32) -> (i32, i32, i32, i32) {
    %c0_i32 = arith.constant 0 : i32
    %c0_i32_0 = arith.constant 0 : i32
    %c0_i32_1 = arith.constant 0 : i32
    %c0_i32_2 = arith.constant 0 : i32
    return %arg0, %c0_i32, %c0_i32_0, %c0_i32_1 : i32, i32, i32, i32
  }
  func.func @transform_1(%arg0: i32) -> (i32, i32, i32) {
    %c0_i32 = arith.constant 0 : i32
    %c0_i32_0 = arith.constant 0 : i32
    %c0_i32_1 = arith.constant 0 : i32
    return %arg0, %c0_i32, %c0_i32_0 : i32, i32, i32
  }
}

</mosaic_0001>

<bundles_post_ra>
// kernel: tpu_custom_call.1
= control target key start
LH: loop header
LB: loop body
LE: loop exit
PB: predicated region body
PF: predicated region fallthrough
CT: control target
= control target key end

     0   :  { %6 = vsyncpa [#allocation5], 0  ;;  %s886_s0 = inlined_call_operand.hbm [shape: f32[4,4,16,32], index: 0, kind: input, shape index: {}]   ;;  %s887_s1 = inlined_call_operand.hbm [shape: f32[4,16,128], index: 1, kind: output, shape index: {}]  }
   0x1   :  { %8 = vsyncpa [#allocation5 + $0x1], 0 }
   0x2   :  { %9 = vsyncpa [#allocation6], 0 }
   0x3   :  { %11 = vsyncpa [#allocation6 + $0x1], 0  ;;  %s689_s6 = smov 0   ;;  %s691_s7 = smov 0  }
   0x4   :  { %s693_s8 = smov 0   ;;  %s695_s9 = smov 0  }
   0x5 LB: > { %s710_s10 = sadd.s32 4294967295, %s671_s9   ;;  %s492_s11 = sadd.s32 4294967294, %s671_s9   ;;  %s671_s9 = sphi %s695_s9, %s900_s9   ;;  %s667_s8 = sphi %s693_s8, %s899_s8   ;;  %s663_s7 = sphi %s691_s7, %s898_s7   ;;  %s659_s6 = sphi %s689_s6, %s897_s6  }
   0x6   : > { %s714_s12 = sadd.s32 1, %s671_s9   ;;  %s24_s13 = sadd.s32 1, %s667_s8 }
   0x7   : > { %s21_s14 = ssub.s32 %s671_s9, %s714_s12  ;;  %p31_p0 = scmp.ne.s32.totalorder %s667_s8, %s663_s7 }
   0x8   : > { %p22_p1 = scmp.eq.s32.totalorder %s21_s14, 0  ;;  %p32_p2 = scmp.eq.s32.totalorder %s671_s9, 0 }
   0x9   : > { %p37_p3 = scmp.ne.s32.totalorder %s663_s7, %s659_s6  ;;  %p38_p4 = scmp.eq.s32.totalorder %s710_s10, 0 }
   0xa   : > { %s726_s15 = scalar_select %p22_p1, %s667_s8, %s24_s13  }
   0xb   : > { %p728_p5 = por %p32_p2, %p31_p0  ;;  %p732_p6 = por %p38_p4, %p37_p3 }
   0xc   : > { %p61_p7 = scmp.eq.s32.totalorder %s710_s10, 1  ;;  %p67_p8 = scmp.eq.s32.totalorder %s492_s11, 1 }
   0xd   : > { %p536_p10 = scmp.lt.s32.totalorder %s671_s9, 2  ;;  %s87_s20 = sand.u32 1, %s667_s8  }
   0xe   : > { %p739_p11 = por %p61_p7, %p31_p0  ;;  %p743_p12 = por %p67_p8, %p37_p3 }
   0xf   : > { %s521_s21 = sshll.u32 %s671_s9, 11  ;;  %s495_s22 = sshll.u32 %s87_s20, 7 }
  0x10   : > { %s891_s18 = scalar_select %p739_p11, 1, 0 }
  0x11   : > { %s892_s19 = scalar_select %p743_p12, 1, 0 }
  0x12   : > { %s752_s25 = scalar_lea.hbm %s886_s0, %s521_s21  ;;  %s91_s26 = scalar_lea.vmem [#allocation4], %s495_s22 }
  0x13   : > { %s99_s27 = sshll.u32 %s91_s26, 4  ;;  %p756_p13 = pnand %p536_p10, %p728_p5  ;;  %s760_s27 = int_to_ptr.vmem [resolvable:$true] %s99_s27 }
  0x14   : > { %s762_s29 = scalar_lea.sflag [#allocation5], %s87_s20  ;;  %s575_s30 = scalar_lea.hbm %s752_s25, 2048 }
  0x15   : > { %p576_p0 = scmp.ne.s32.totalorder %s752_s25, %s575_s30  ;;  %p577_p1 = pneg %p756_p13 }
  0x16   : > { %s580_s4 = scalar_lea.hbm %s886_s0, 4096  ;;  %p581_p4 = scmp.lt.u32.totalorder %s752_s25, %s886_s0 }
  0x17   : > { %p578_p2 = pnand %p577_p1, %p576_p0  ;;  %p582_p5 = scmp.lt.u32.totalorder %s580_s4, %s575_s30 }
  0x18   : > { %p584_p8 = scmp.lt.u32.totalorder %s575_s30, %s752_s25 }
  0x19   : > { %p579_p3 = pneg %p578_p2  ;;  %p583_p7 = por %p582_p5, %p581_p4 }
  0x1b   : > { %p585_p10 = por %p584_p8, %p583_p7 }
  0x1d   : > { %p586_p9 = pnand %p585_p10, %p579_p3 }
  0x1f   : > { %589 = shalt.err (!%p586_p9)
}
  0x20   : > { %s590_s13 = scalar_lea.vmem %s760_s27, 2048  ;;  %s673_s14 = smov [#allocation4]  }
  0x21   : > { %p591_p0 = scmp.ne.s32.totalorder %s760_s27, %s590_s13  ;;  %s595_s16 = sshll.u32 %s673_s14, 4  ;;  %s596_s16 = int_to_ptr.vmem [resolvable:$false] %s595_s16 }
  0x22   : > { %s597_s20 = scalar_lea.vmem %s596_s16, 4096  ;;  %p598_p11 = scmp.lt.s32.totalorder %s760_s27, %s596_s16 }
  0x23   : > { %p593_p2 = pnand %p591_p0, %p577_p1  ;;  %p599_p4 = scmp.lt.s32.totalorder %s597_s20, %s590_s13 }
  0x25   : > { %p594_p12 = pneg %p593_p2  ;;  %p600_p5 = por %p599_p4, %p598_p11 }
  0x27   : > { %p601_p7 = pnand %p600_p5, %p594_p12 }
  0x29   : > { %604 = shalt.err (!%p601_p7)
}
  0x2a   : > { %s674_s21 = smov 128   ;;  %s675_s22 = smov 8  }
  0x2b   : > { %531 = dma.hbm_to_vmem [thread:$0]  (!%p756_p13), %s752_s25, 2048, %s760_s27, %s762_s29, %s674_s21, %s674_s21, %s675_s22  }
  0x2c   : > { %p499_p9 = scmp.ge.s32.totalorder %s671_s9, 1  ;;  %p107_p1 = scmp.lt.s32.totalorder %s671_s9, 3 }
  0x2e   : > { %p108_p3 = pnand %p499_p9, %p107_p1 }
  0x2f   : > { %s793_s23 = sand.u32 (!%p108_p3), 1, %s663_s7  }
  0x30   : > { %111 = sbr.rel (%p108_p3) target bundleno = 384 (0x180), region = 24  ;;  %s500_s24 = sshll.u32 (!%p108_p3), %s793_s23, 7 }
  0x31   : > { %s114_s26 = scalar_lea.sflag (!%p108_p3), [#allocation5], %s793_s23  ;;  %s797_s30 = scalar_lea.vmem (!%p108_p3), [#allocation4], %s500_s24 }
  0x37   : > { %650 = dma.done.wait (%p732_p6), %s114_s26, 2048  }
  0x38   : > { %652 = vsyncadd (%p732_p6), %s114_s26, 4294965248  ;;  %v138_v0 = vld [vmem:[%s797_s30] sm:$0xff]  ;;  %v502_v1 = vld [vmem:[%s797_s30 + $0x10] sm:$0xff]  ;;  %vm174_vm0 = vcmask 261120   ;;  %s501_s17 = sshll.u32 %s793_s23, 5  ;;  %s523_s28 = sshll.u32 %s710_s10, 9 }
  0x39   : > { %142 = vxpose.xlu0.b32.start [1/4] (short) (narrow) %v138_v0, 32  ;;  %198 = vxpose.xlu1.b32.start [1/4] (short) (narrow) %v502_v1, 32  ;;  %v139_v2 = vld [vmem:[%s797_s30 + $0x8] sm:$0xff]  ;;  %v503_v3 = vld [vmem:[%s797_s30 + $0x18] sm:$0xff]  ;;  %v140_v4 = vld [vmem:[%s797_s30 + $0x40] sm:$0xff]  ;;  %s135_s25 = scalar_lea.vmem [#allocation7], %s501_s17  ;;  %s842_s3 = scalar_lea.hbm %s887_s1, %s523_s28 }
  0x3a   : > { %v504_v5 = vld [vmem:[%s797_s30 + $0x50] sm:$0xff]  ;;  %v141_v6 = vld [vmem:[%s797_s30 + $0x48] sm:$0xff]  ;;  %v505_v7 = vld [vmem:[%s797_s30 + $0x58] sm:$0xff]  ;;  %s419_s27 = sshll.u32 %s135_s25, 4  ;;  %s405_s4 = scalar_lea.sflag [#allocation6], %s793_s23  ;;  %s837_s27 = int_to_ptr.vmem [resolvable:$true] %s419_s27 }
  0x3b   : > { %v506_v8 = vld [vmem:[%s797_s30 + $0x20] sm:$0xff]  ;;  %v510_v9 = vld [vmem:[%s797_s30 + $0x30] sm:$0xff]  ;;  %v507_v10 = vld [vmem:[%s797_s30 + $0x28] sm:$0xff]  ;;  %s605_s5 = scalar_lea.vmem %s837_s27, 512  ;;  %p894_p11 = scmp.ne.s32.totalorder %s891_s18, 0 }
  0x3c   : > { %v511_v11 = vld [vmem:[%s797_s30 + $0x38] sm:$0xff]  ;;  %v508_v12 = vld [vmem:[%s797_s30 + $0x60] sm:$0xff]  ;;  %v512_v13 = vld [vmem:[%s797_s30 + $0x70] sm:$0xff]  ;;  %p606_p6 = scmp.ne.s32.totalorder %s837_s27, %s605_s5  ;;  %s676_s10 = smov [#allocation7]  }
  0x3d   : > { %143 = vxpose.xlu0.b32.cont [2/4] (short) (narrow) %v139_v2, 32  ;;  %199 = vxpose.xlu1.b32.cont [2/4] (short) (narrow) %v503_v3, 32  ;;  %v509_v14 = vld [vmem:[%s797_s30 + $0x68] sm:$0xff]  ;;  %v513_v15 = vld [vmem:[%s797_s30 + $0x78] sm:$0xff]  ;;  %s609_s11 = sshll.u32 %s676_s10, 4  ;;  %s610_s11 = int_to_ptr.vmem [resolvable:$false] %s609_s11 }
  0x3e   : > { %p607_p12 = pnand %p606_p6, %p894_p11  ;;  %s611_s13 = scalar_lea.vmem %s610_s11, 1024 }
  0x3f   : > { %p612_p8 = scmp.lt.s32.totalorder %s837_s27, %s610_s11  ;;  %p613_p10 = scmp.lt.s32.totalorder %s611_s13, %s605_s5 }
  0x40   : > { %p608_p13 = pneg %p607_p12 }
  0x41   : > { %144 = vxpose.xlu0.b32.cont [3/4] (short) (narrow) %v140_v4, 32  ;;  %200 = vxpose.xlu1.b32.cont [3/4] (short) (narrow) %v504_v5, 32  ;;  %p614_p0 = por %p613_p10, %p612_p8 }
  0x43   : > { %p615_p2 = pnand %p614_p0, %p608_p13 }
  0x45   : > { %145 = vxpose.xlu0.b32.end [4/4] (short) (narrow) %v141_v6, 32  ;;  %201 = vxpose.xlu1.b32.end [4/4] (short) (narrow) %v505_v7, 32 }
  0x49   : > { %251 = vxpose.xlu0.b32.start [1/4] (short) (narrow) %v506_v8, 32  ;;  %304 = vxpose.xlu1.b32.start [1/4] (short) (narrow) %v510_v9, 32 }
  0x4d   : > { %252 = vxpose.xlu0.b32.cont [2/4] (short) (narrow) %v507_v10, 32  ;;  %305 = vxpose.xlu1.b32.cont [2/4] (short) (narrow) %v511_v11, 32 }
  0x51   : > { %253 = vxpose.xlu0.b32.cont [3/4] (short) (narrow) %v508_v12, 32  ;;  %306 = vxpose.xlu1.b32.cont [3/4] (short) (narrow) %v512_v13, 32 }
  0x55   : > { %254 = vxpose.xlu0.b32.end [4/4] (short) (narrow) %v509_v14, 32  ;;  %307 = vxpose.xlu1.b32.end [4/4] (short) (narrow) %v513_v15, 32 }
  0xb9   : > { %v158_v16 = vpop.trf.xlu0  ;;  %v214_v17 = vpop.trf.xlu1 }
  0xba   : > { %175 = vst.msk [vmem:[#allocation2] sm:$0xff] %vm174_vm0, %v158_v16 }
  0xbd   : > { %v159_v18 = vpop.trf.xlu0  ;;  %v215_v19 = vpop.trf.xlu1 }
  0xbe   : > { %176 = vst.msk [vmem:[#allocation2 + $0x8] sm:$0xff] %vm174_vm0, %v159_v18 }
  0xc1   : > { %v160_v20 = vpop.trf.xlu0  ;;  %v216_v21 = vpop.trf.xlu1 }
  0xc2   : > { %177 = vst.msk [vmem:[#allocation2 + $0x10] sm:$0xff] %vm174_vm0, %v160_v20 }
  0xc5   : > { %v179_v22 = vld [vmem:[#allocation2] ss:$2 sm:$0xff]  ;;  %v186_v23 = vld [vmem:[#allocation2 + $0x1] ss:$2 sm:$0xff]  ;;  %v161_v24 = vpop.trf.xlu0  ;;  %v217_v25 = vpop.trf.xlu1 }
  0xc6   : > { %230 = vst.msk [vmem:[#allocation2] sm:$0xff] %vm174_vm0, %v214_v17  ;;  %182 = vst [vmem:[#allocation3] ss:$4 sm:$0xff] %v179_v22 }
  0xc7   : > { %190 = vst [vmem:[#allocation3 + $0x1] ss:$4 sm:$0xff] %v186_v23  ;;  %231 = vst.msk [vmem:[#allocation2 + $0x8] sm:$0xff] %vm174_vm0, %v215_v19 }
  0xc8   : > { %178 = vst.msk [vmem:[#allocation2 + $0x18] sm:$0xff] %vm174_vm0, %v161_v24 }
  0xc9   : > { %v267_v26 = vpop.trf.xlu0  ;;  %v320_v27 = vpop.trf.xlu1 }
  0xcd   : > { %v268_v31 = vpop.trf.xlu0  ;;  %v321_v33 = vpop.trf.xlu1 }
  0xce   : > { %v234_v30 = vld [vmem:[#allocation2] ss:$2 sm:$0xff]  ;;  %v240_v32 = vld [vmem:[#allocation2 + $0x1] ss:$2 sm:$0xff] }
  0xcf   : > { %v181_v28 = vld [vmem:[#allocation2 + $0x10] ss:$2 sm:$0xff]  ;;  %v188_v29 = vld [vmem:[#allocation2 + $0x11] ss:$2 sm:$0xff]  ;;  %237 = vst [vmem:[#allocation3 + $0x40] ss:$4 sm:$0xff] %v234_v30 }
  0xd0   : > { %184 = vst [vmem:[#allocation3 + $0x20] ss:$4 sm:$0xff] %v181_v28  ;;  %192 = vst [vmem:[#allocation3 + $0x21] ss:$4 sm:$0xff] %v188_v29 }
  0xd1   : > { %232 = vst.msk [vmem:[#allocation2 + $0x10] sm:$0xff] %vm174_vm0, %v216_v21  ;;  %233 = vst.msk [vmem:[#allocation2 + $0x18] sm:$0xff] %vm174_vm0, %v217_v25  ;;  %v269_v34 = vpop.trf.xlu0  ;;  %v322_v38 = vpop.trf.xlu1 }
  0xd2   : > { %283 = vst.msk [vmem:[#allocation2] sm:$0xff] %vm174_vm0, %v267_v26  ;;  %243 = vst [vmem:[#allocation3 + $0x41] ss:$4 sm:$0xff] %v240_v32 }
  0xd3   : > { %284 = vst.msk [vmem:[#allocation2 + $0x8] sm:$0xff] %vm174_vm0, %v268_v31 }
  0xd5   : > { %v270_v37 = vpop.trf.xlu0  ;;  %v323_v41 = vpop.trf.xlu1 }
  0xd8   : > { %v235_v35 = vld [vmem:[#allocation2 + $0x10] ss:$2 sm:$0xff]  ;;  %v241_v36 = vld [vmem:[#allocation2 + $0x11] ss:$2 sm:$0xff] }
  0xd9   : > { %285 = vst.msk [vmem:[#allocation2 + $0x10] sm:$0xff] %vm174_vm0, %v269_v34  ;;  %239 = vst [vmem:[#allocation3 + $0x60] ss:$4 sm:$0xff] %v235_v35 }
  0xda   : > { %v287_v39 = vld [vmem:[#allocation2] ss:$2 sm:$0xff]  ;;  %v293_v40 = vld [vmem:[#allocation2 + $0x1] ss:$2 sm:$0xff]  ;;  %245 = vst [vmem:[#allocation3 + $0x61] ss:$4 sm:$0xff] %v241_v36 }
  0xdb   : > { %286 = vst.msk [vmem:[#allocation2 + $0x18] sm:$0xff] %vm174_vm0, %v270_v37  ;;  %290 = vst [vmem:[#allocation3 + $0x2] ss:$4 sm:$0xff] %v287_v39 }
  0xdc   : > { %296 = vst [vmem:[#allocation3 + $0x3] ss:$4 sm:$0xff] %v293_v40  ;;  %336 = vst.msk [vmem:[#allocation2] sm:$0xff] %vm174_vm0, %v320_v27 }
  0xdd   : > { %337 = vst.msk [vmem:[#allocation2 + $0x8] sm:$0xff] %vm174_vm0, %v321_v33 }
  0xe2   : > { %v288_v42 = vld [vmem:[#allocation2 + $0x10] ss:$2 sm:$0xff]  ;;  %v294_v43 = vld [vmem:[#allocation2 + $0x11] ss:$2 sm:$0xff] }
  0xe3   : > { %292 = vst [vmem:[#allocation3 + $0x22] ss:$4 sm:$0xff] %v288_v42  ;;  %298 = vst [vmem:[#allocation3 + $0x23] ss:$4 sm:$0xff] %v294_v43  ;;  %v352_v44 = vld [vmem:[#allocation3] sm:$0xff]  ;;  %v353_v47 = vld [vmem:[#allocation3 + $0x8] sm:$0xff] }
  0xe4   : > { %338 = vst.msk [vmem:[#allocation2 + $0x10] sm:$0xff] %vm174_vm0, %v322_v38  ;;  %339 = vst.msk [vmem:[#allocation2 + $0x18] sm:$0xff] %vm174_vm0, %v323_v41  ;;  %368 = vxpose.xlu0.b32.start [1/16] (narrow) %v352_v44, 32  ;;  %v340_v45 = vld [vmem:[#allocation2] ss:$2 sm:$0xff]  ;;  %v354_v48 = vld [vmem:[#allocation3 + $0x10] sm:$0xff] }
  0xe5   : > { %v346_v46 = vld [vmem:[#allocation2 + $0x1] ss:$2 sm:$0xff]  ;;  %343 = vst [vmem:[#allocation3 + $0x42] ss:$4 sm:$0xff] %v340_v45  ;;  %v355_v51 = vld [vmem:[#allocation3 + $0x18] sm:$0xff] }
  0xe6   : > { %349 = vst [vmem:[#allocation3 + $0x43] ss:$4 sm:$0xff] %v346_v46 }
  0xe8   : > { %369 = vxpose.xlu0.b32.cont [2/16] (narrow) %v353_v47, 32 }
  0xea   : > { %v356_v52 = vld [vmem:[#allocation3 + $0x20] sm:$0xff]  ;;  %v357_v53 = vld [vmem:[#allocation3 + $0x28] sm:$0xff]  ;;  %v358_v54 = vld [vmem:[#allocation3 + $0x30] sm:$0xff] }
  0xeb   : > { %v341_v49 = vld [vmem:[#allocation2 + $0x10] ss:$2 sm:$0xff]  ;;  %v347_v50 = vld [vmem:[#allocation2 + $0x11] ss:$2 sm:$0xff] }
  0xec   : > { %370 = vxpose.xlu0.b32.cont [3/16] (narrow) %v354_v48, 32  ;;  %345 = vst [vmem:[#allocation3 + $0x62] ss:$4 sm:$0xff] %v341_v49  ;;  %351 = vst [vmem:[#allocation3 + $0x63] ss:$4 sm:$0xff] %v347_v50  ;;  %v359_v55 = vld [vmem:[#allocation3 + $0x38] sm:$0xff] }
  0xed   : > { %v360_v56 = vld [vmem:[#allocation3 + $0x40] sm:$0xff]  ;;  %v361_v57 = vld [vmem:[#allocation3 + $0x48] sm:$0xff]  ;;  %v362_v58 = vld [vmem:[#allocation3 + $0x50] sm:$0xff] }
  0xee   : > { %v363_v59 = vld [vmem:[#allocation3 + $0x58] sm:$0xff] }
  0xf0   : > { %371 = vxpose.xlu0.b32.cont [4/16] (narrow) %v355_v51, 32 }
  0xf3   : > { %v364_v60 = vld [vmem:[#allocation3 + $0x60] sm:$0xff]  ;;  %v365_v61 = vld [vmem:[#allocation3 + $0x68] sm:$0xff]  ;;  %v366_v62 = vld [vmem:[#allocation3 + $0x70] sm:$0xff] }
  0xf4   : > { %372 = vxpose.xlu0.b32.cont [5/16] (narrow) %v356_v52, 32  ;;  %v367_v63 = vld [vmem:[#allocation3 + $0x78] sm:$0xff] }
  0xf8   : > { %373 = vxpose.xlu0.b32.cont [6/16] (narrow) %v357_v53, 32 }
  0xfc   : > { %374 = vxpose.xlu0.b32.cont [7/16] (narrow) %v358_v54, 32 }
 0x100   : > { %375 = vxpose.xlu0.b32.cont [8/16] (narrow) %v359_v55, 32 }
 0x104   : > { %376 = vxpose.xlu0.b32.cont [9/16] (narrow) %v360_v56, 32 }
 0x108   : > { %377 = vxpose.xlu0.b32.cont [10/16] (narrow) %v361_v57, 32 }
 0x10c   : > { %378 = vxpose.xlu0.b32.cont [11/16] (narrow) %v362_v58, 32 }
 0x110   : > { %379 = vxpose.xlu0.b32.cont [12/16] (narrow) %v363_v59, 32 }
 0x114   : > { %380 = vxpose.xlu0.b32.cont [13/16] (narrow) %v364_v60, 32 }
 0x118   : > { %381 = vxpose.xlu0.b32.cont [14/16] (narrow) %v365_v61, 32 }
 0x11c   : > { %382 = vxpose.xlu0.b32.cont [15/16] (narrow) %v366_v62, 32 }
 0x120   : > { %383 = vxpose.xlu0.b32.end [16/16] (narrow) %v367_v63, 32 }
 0x164   : > { %v384_v0 = vpop.trf.xlu0 }
 0x165   : > { %400 = vst [vmem:[%s135_s25] sm:$0xff] %v384_v0 }
 0x168   : > { %v385_v1 = vpop.trf.xlu0 }
 0x169   : > { %401 = vst [vmem:[%s135_s25 + $0x8] sm:$0xff] %v385_v1 }
 0x16c   : > { %v386_v2 = vpop.trf.xlu0 }
 0x16d   : > { %402 = vst [vmem:[%s135_s25 + $0x10] sm:$0xff] %v386_v2 }
 0x170   : > { %v387_v3 = vpop.trf.xlu0 }
 0x171   : > { %403 = vst [vmem:[%s135_s25 + $0x18] sm:$0xff] %v387_v3 }
 0x172   : > { %618 = shalt.err (!%p615_p2)
}
 0x173   : > { %s619_s14 = scalar_lea.hbm %s842_s3, 512  ;;  %s623_s21 = scalar_lea.hbm %s887_s1, 1024 }
 0x174   : > { %p620_p4 = scmp.ne.s32.totalorder %s842_s3, %s619_s14  ;;  %p624_p9 = scmp.lt.u32.totalorder %s842_s3, %s887_s1 }
 0x175   : > { %p625_p1 = scmp.lt.u32.totalorder %s623_s21, %s619_s14  ;;  %p627_p6 = scmp.lt.u32.totalorder %s619_s14, %s842_s3 }
 0x176   : > { %p621_p5 = pnand %p620_p4, %p894_p11 }
 0x177   : > { %p626_p3 = por %p625_p1, %p624_p9 }
 0x178   : > { %p622_p7 = pneg %p621_p5 }
 0x179   : > { %p628_p12 = por %p627_p6, %p626_p3 }
 0x17b   : > { %p629_p13 = pnand %p628_p12, %p622_p7 }
 0x17d   : > { %632 = shalt.err (!%p629_p13)
}
 0x17e   : > { %s677_s26 = smov 128   ;;  %s678_s30 = smov 8  }
 0x17f   : > { %526 = dma.vmem_to_hbm [thread:$0]  (%p894_p11), %s837_s27, 512, %s842_s3, %s405_s4, %s677_s26, %s677_s26, %s678_s30  }
 0x180 PF: > { %s434_s17 = sand.u32 1, %s659_s6   ;;  %p895_p8 = scmp.ne.s32.totalorder %s892_s19, 0 }
 0x181   : > { %p896_p10 = scmp.ge.s32.totalorder %s671_s9, 2  ;;  %s435_s25 = scalar_lea.sflag [#allocation6], %s434_s17 }
 0x183   : > { %p533_p0 = pnand %p896_p10, %p895_p8 }
 0x185   : > { %654 = dma.done.wait (!%p533_p0), %s435_s25, 512  }
 0x186   : > { %656 = vsyncadd (!%p533_p0), %s435_s25, 4294966784  ;;  %p14_p2 = scmp.ge.s32.totalorder %s714_s12, 4   ;;  %s897_s6 = smov %s663_s7 }
 0x187   : > { %s898_s7 = smov %s667_s8  ;;  %s899_s8 = smov %s726_s15 }
 0x188   : > { %s900_s9 = smov %s714_s12  ;;  %16 = sbr.rel (!%p14_p2) target bundleno = 5 (0x5), region = 90 }
 0x18f   :  { %440 = vsyncpa [#allocation5], 1 }
 0x190   :  { %442 = vsyncpa [#allocation5 + $0x1], 1 }
 0x191   :  { %443 = vsyncpa [#allocation6], 1 }
 0x192   :  { %445 = vsyncpa [#allocation6 + $0x1], 1 }

</bundles_post_ra>
